<compile_context>
chip_gen: v5e
topology: v5e:2x2
jax: 0.10.0
libtpu: 0.0.40
codegen_flags: <defaults>
</compile_context>

<pallas_src>
import functools

import jax
import jax.numpy as jnp
from jax.experimental import pallas as pl
from jax.experimental.pallas import tpu as pltpu


def _rmsnorm(x, w, eps=1e-6):
    # F.rms_norm(x, (dim,), weight, eps)
    var = jnp.mean(x * x, axis=-1, keepdims=True)
    return x * jax.lax.rsqrt(var + eps) * w


def block_kernel(x_ref, bias_ref, attn_nw_ref, wqkv_ref, wo_ref,
                 ffn_nw_ref, w13_ref, w2_ref, o_ref,
                 *, n_head, qk_dim, v_dim, hid, mxu_dtype):
    x = x_ref[...]                                   # (S, D) f32, one batch row
    hdk = n_head * qk_dim

    # ---- attn_norm ----
    xn = _rmsnorm(x, attn_nw_ref[...])               # (S, D) f32

    # ---- fused QKV projection: one wide MXU matmul (scale folded into wq) ----
    qkv = jnp.dot(xn.astype(mxu_dtype), wqkv_ref[...],
                  preferred_element_type=jnp.float32)          # (S, H*(2Dk+Dv))
    q_all = qkv[:, :hdk].astype(mxu_dtype)                     # (S, H*Dk)
    k_all = qkv[:, hdk:2 * hdk].astype(mxu_dtype)              # (S, H*Dk)
    v_all = qkv[:, 2 * hdk:].astype(mxu_dtype)                 # (S, H*Dv)

    # ---- per-head scores + softmax (deferred normalization) ----
    dn_qk = (((1,), (1,)), ((), ()))                 # contract last dims: 'sk,Sk->sS'
    outs = []
    for h in range(n_head):                          # static, tiny head count
        qh = q_all[:, h * qk_dim:(h + 1) * qk_dim]
        kh = k_all[:, h * qk_dim:(h + 1) * qk_dim]
        vh = v_all[:, h * v_dim:(h + 1) * v_dim]
        s = jax.lax.dot_general(qh, kh, dn_qk,
                                preferred_element_type=jnp.float32)   # (S, S)
        s = s + bias_ref[h]                          # bias = pos_embedding + mask
        m = jnp.max(s, axis=-1, keepdims=True)
        p = jnp.exp(s - m)
        denom = jnp.sum(p, axis=-1, keepdims=True)
        pv = jnp.dot(p.astype(mxu_dtype), vh,
                     preferred_element_type=jnp.float32)              # (S, Dv)
        # normalize the small (S, Dv) result, not the (S, S) prob matrix;
        # exact reciprocal keeps parity with the reference tight.
        outs.append(pv * pl.reciprocal(denom, approx=False))

    # ---- output projection: one matmul over all heads ----
    oh = jnp.concatenate(outs, axis=-1)                               # (S, H*Dv)
    attn = jnp.dot(oh.astype(mxu_dtype), wo_ref[...],
                   preferred_element_type=jnp.float32)                # (S, D)

    # ---- residual 1 ----
    x1 = x + attn

    # ---- ffn_norm + SwiGLU feed-forward (fused w1/w3) ----
    xn2 = _rmsnorm(x1, ffn_nw_ref[...])
    h13 = jnp.dot(xn2.astype(mxu_dtype), w13_ref[...],
                  preferred_element_type=jnp.float32)                 # (S, 2*hid)
    h1 = h13[:, :hid]
    h3 = h13[:, hid:]
    hidden = jax.nn.silu(h1) * h3
    ffn = jnp.dot(hidden.astype(mxu_dtype), w2_ref[...],
                  preferred_element_type=jnp.float32)                 # (S, D)

    # ---- residual 2 ----
    o_ref[...] = (x1 + ffn).astype(o_ref.dtype)


def prepare_block_params(params, *, n_head, qk_dim, v_dim, mxu_dtype=jnp.bfloat16):
    """One-time weight re-layout (do this at parameter-init time, not per call)."""
    (attn_norm_w, wq, wk, wv, wo, ffn_norm_w, w1, w2, w3) = params
    D = wq.shape[1]
    scale = 1.0 / (qk_dim ** 0.5)
    # fold the softmax scale into wq, pack q/k/v into one (D, H*(2Dk+Dv)) weight
    wqkv = jnp.concatenate([(wq * scale).T, wk.T, wv.T], axis=1).astype(mxu_dtype)
    wo_t = wo.T.astype(mxu_dtype)                                    # (H*Dv, D)
    w13 = jnp.concatenate([w1.T, w3.T], axis=1).astype(mxu_dtype)    # (D, 2*4D)
    w2_t = w2.T.astype(mxu_dtype)                                    # (4D, D)
    attn_nw = attn_norm_w.reshape(1, D).astype(jnp.float32)
    ffn_nw = ffn_norm_w.reshape(1, D).astype(jnp.float32)
    return (attn_nw, wqkv, wo_t, ffn_nw, w13, w2_t)


def block_forward(x, mask, pos_embedding, prepared, *, n_head, qk_dim, v_dim,
                  mxu_dtype=jnp.bfloat16):
    B, S, D = x.shape
    attn_nw, wqkv, wo_t, ffn_nw, w13, w2_t = prepared
    hid = w2_t.shape[0]

    # fold the additive mask into the per-head position bias (f32 elementwise)
    bias = (pos_embedding + mask[None, :, :]).astype(jnp.float32)    # (H, S, S)

    def const_spec(a):
        nd = a.ndim
        return pl.BlockSpec(a.shape, lambda b, _nd=nd: (0,) * _nd)   # resident across grid

    kernel = functools.partial(block_kernel, n_head=n_head, qk_dim=qk_dim,
                               v_dim=v_dim, hid=hid, mxu_dtype=mxu_dtype)

    out = pl.pallas_call(
        kernel,
        out_shape=jax.ShapeDtypeStruct((B, S, D), x.dtype),
        grid=(B,),                                    # tile activations over batch
        in_specs=[
            pl.BlockSpec((None, S, D), lambda b: (b, 0, 0)),   # x (batch-tiled)
            const_spec(bias),
            const_spec(attn_nw),
            const_spec(wqkv),
            const_spec(wo_t),
            const_spec(ffn_nw),
            const_spec(w13),
            const_spec(w2_t),
        ],
        out_specs=pl.BlockSpec((None, S, D), lambda b: (b, 0, 0)),
        compiler_params=pltpu.CompilerParams(
            dimension_semantics=("parallel",)),        # megacore-shardable on v7x
    )(x, bias, attn_nw, wqkv, wo_t, ffn_nw, w13, w2_t)
    return out


def block_reference(x, mask, pos_embedding, params, *, n_head, qk_dim, v_dim):
    """Pure-JAX f32 reference matching the PyTorch forward (non-flash branch)."""
    (attn_norm_w, wq, wk, wv, wo, ffn_norm_w, w1, w2, w3) = params
    B, S, D = x.shape
    xn = _rmsnorm(x, attn_norm_w)
    q = (xn @ wq.T).reshape(B, S, n_head, qk_dim)
    k = (xn @ wk.T).reshape(B, S, n_head, qk_dim)
    v = (xn @ wv.T).reshape(B, S, n_head, v_dim)
    score = jnp.einsum("bshk,bShk->bhsS", q, k) / (qk_dim ** 0.5)
    score = score + pos_embedding[None] + mask[None, None]
    score = jax.nn.softmax(score, axis=-1)
    out = jnp.einsum("bhsS,bShv->bshv", score, v).reshape(B, S, n_head * v_dim)
    h_att = out @ wo.T
    x = x + h_att
    xn2 = _rmsnorm(x, ffn_norm_w)
    ffn = (jax.nn.silu(xn2 @ w1.T) * (xn2 @ w3.T)) @ w2.T
    return x + ffn


if __name__ == "__main__":
    # Small shapes consistent with the module (use_moe=False).
    B, S, D = 2, 8, 32
    H, Dk, Dv = 2, 16, 16
    HID = 4 * D

    key = jax.random.PRNGKey(0)
    ks = jax.random.split(key, 12)
    scale = 0.05

    x = jax.random.normal(ks[0], (B, S, D), dtype=jnp.float32)
    pos_embedding = 0.1 * jax.random.normal(ks[1], (H, S, S), dtype=jnp.float32)
    # causal mask (as `mask[:s, :s]` added to the scores)
    causal = jnp.tril(jnp.ones((S, S), dtype=bool))
    mask = jnp.where(causal, 0.0, -1e9).astype(jnp.float32)

    params = (
        jnp.ones((D,), jnp.float32),                                   # attn_norm weight
        scale * jax.random.normal(ks[2], (H * Dk, D), jnp.float32),    # wq
        scale * jax.random.normal(ks[3], (H * Dk, D), jnp.float32),    # wk
        scale * jax.random.normal(ks[4], (H * Dv, D), jnp.float32),    # wv
        scale * jax.random.normal(ks[5], (D, H * Dv), jnp.float32),    # wo
        jnp.ones((D,), jnp.float32),                                   # ffn_norm weight
        scale * jax.random.normal(ks[6], (HID, D), jnp.float32),       # w1
        scale * jax.random.normal(ks[7], (D, HID), jnp.float32),       # w2
        scale * jax.random.normal(ks[8], (HID, D), jnp.float32),       # w3
    )

    # One-time weight layout prep (fuse/transpose/fold-scale/bf16-cast).
    prepared = prepare_block_params(params, n_head=H, qk_dim=Dk, v_dim=Dv)

    out = block_forward(x, mask, pos_embedding, prepared,
                        n_head=H, qk_dim=Dk, v_dim=Dv)
    out = jax.block_until_ready(out)

    ref = block_reference(x, mask, pos_embedding, params,
                          n_head=H, qk_dim=Dk, v_dim=Dv)
    assert out.shape == (B, S, D)
    # Kernel matmul inputs are bf16 (f32 accumulate) while the reference is pure
    # f32; softmax uses an exact reciprocal, so bf16 rounding is the only delta.
    assert jnp.allclose(out, ref, atol=1e-2, rtol=1e-2), "mismatch vs reference"

    print("KERNEL_OK")
</pallas_src>

<mosaic_0001>
module attributes {stable_mosaic.version = 11 : i64} {
  func.func @block_kernel(%arg0: i32, %arg1: memref<1x8x32xf32, #tpu.memory_space<vmem>>, %arg2: memref<2x8x8xf32, #tpu.memory_space<vmem>>, %arg3: memref<1x32xf32, #tpu.memory_space<vmem>>, %arg4: memref<32x96xbf16, #tpu.memory_space<vmem>>, %arg5: memref<32x32xbf16, #tpu.memory_space<vmem>>, %arg6: memref<1x32xf32, #tpu.memory_space<vmem>>, %arg7: memref<32x256xbf16, #tpu.memory_space<vmem>>, %arg8: memref<128x32xbf16, #tpu.memory_space<vmem>>, %arg9: memref<1x8x32xf32, #tpu.memory_space<vmem>>) attributes {dimension_semantics = [#tpu.dimension_semantics<parallel>], iteration_bounds = array<i64: 2>, scalar_prefetch = 0 : i64, scratch_operands = 0 : i64, tpu.core_type = #tpu.core_type<tc>, window_params = [{transform_indices = @transform_0, window_bounds = array<i64: 1, 8, 32>}, {pipeline_mode = #tpu.pipeline_mode<synchronous>, transform_indices = @transform_1, window_bounds = array<i64: 2, 8, 8>}, {pipeline_mode = #tpu.pipeline_mode<synchronous>, transform_indices = @transform_2, window_bounds = array<i64: 1, 32>}, {pipeline_mode = #tpu.pipeline_mode<synchronous>, transform_indices = @transform_3, window_bounds = array<i64: 32, 96>}, {pipeline_mode = #tpu.pipeline_mode<synchronous>, transform_indices = @transform_4, window_bounds = array<i64: 32, 32>}, {pipeline_mode = #tpu.pipeline_mode<synchronous>, transform_indices = @transform_5, window_bounds = array<i64: 1, 32>}, {pipeline_mode = #tpu.pipeline_mode<synchronous>, transform_indices = @transform_6, window_bounds = array<i64: 32, 256>}, {pipeline_mode = #tpu.pipeline_mode<synchronous>, transform_indices = @transform_7, window_bounds = array<i64: 128, 32>}, {transform_indices = @transform_8, window_bounds = array<i64: 1, 8, 32>}]} {
    %c0 = arith.constant 0 : index
    %c0_0 = arith.constant 0 : index
    %c0_1 = arith.constant 0 : index
    %0 = vector.load %arg1[%c0, %c0_0, %c0_1] : memref<1x8x32xf32, #tpu.memory_space<vmem>>, vector<1x8x32xf32>
    %1 = vector.shape_cast %0 : vector<1x8x32xf32> to vector<8x32xf32>
    %c0_2 = arith.constant 0 : index
    %c0_3 = arith.constant 0 : index
    %2 = vector.load %arg3[%c0_2, %c0_3] : memref<1x32xf32, #tpu.memory_space<vmem>>, vector<1x32xf32>
    %3 = arith.mulf %1, %1 : vector<8x32xf32>
    %cst = arith.constant dense<0.000000e+00> : vector<8xf32>
    %4 = vector.multi_reduction <add>, %3, %cst [1] : vector<8x32xf32> to vector<8xf32>
    %5 = vector.shape_cast %4 : vector<8xf32> to vector<8x1xf32>
    %cst_4 = arith.constant 3.200000e+01 : f32
    %6 = vector.broadcast %cst_4 : f32 to vector<8x1xf32>
    %7 = arith.divf %5, %6 : vector<8x1xf32>
    %cst_5 = arith.constant 9.99999997E-7 : f32
    %8 = vector.broadcast %cst_5 : f32 to vector<8x1xf32>
    %9 = arith.addf %7, %8 : vector<8x1xf32>
    %10 = math.rsqrt %9 : vector<8x1xf32>
    %11 = vector.broadcast %10 : vector<8x1xf32> to vector<8x32xf32>
    %12 = arith.mulf %1, %11 : vector<8x32xf32>
    %13 = vector.broadcast %2 : vector<1x32xf32> to vector<8x32xf32>
    %14 = arith.mulf %12, %13 : vector<8x32xf32>
    %15 = arith.truncf %14 : vector<8x32xf32> to vector<8x32xbf16>
    %c0_6 = arith.constant 0 : index
    %c0_7 = arith.constant 0 : index
    %16 = vector.load %arg4[%c0_6, %c0_7] : memref<32x96xbf16, #tpu.memory_space<vmem>>, vector<32x96xbf16>
    %cst_8 = arith.constant dense<0.000000e+00> : vector<8x96xf32>
    %17 = tpu.matmul %15, %16, %cst_8 {dimension_numbers = #tpu.dot_dimension_numbers<[1], [0], [0], [1], [0, 0, 1, 1], [], []>} : vector<8x32xbf16>, vector<32x96xbf16>, vector<8x96xf32> -> vector<8x96xf32>
    %18 = vector.extract_strided_slice %17 {offsets = [0, 0], sizes = [8, 32], strides = [1, 1]} : vector<8x96xf32> to vector<8x32xf32>
    %19 = arith.truncf %18 : vector<8x32xf32> to vector<8x32xbf16>
    %20 = vector.extract_strided_slice %17 {offsets = [0, 32], sizes = [8, 32], strides = [1, 1]} : vector<8x96xf32> to vector<8x32xf32>
    %21 = arith.truncf %20 : vector<8x32xf32> to vector<8x32xbf16>
    %22 = vector.extract_strided_slice %17 {offsets = [0, 64], sizes = [8, 32], strides = [1, 1]} : vector<8x96xf32> to vector<8x32xf32>
    %23 = arith.truncf %22 : vector<8x32xf32> to vector<8x32xbf16>
    %24 = vector.extract_strided_slice %19 {offsets = [0, 0], sizes = [8, 16], strides = [1, 1]} : vector<8x32xbf16> to vector<8x16xbf16>
    %25 = vector.extract_strided_slice %21 {offsets = [0, 0], sizes = [8, 16], strides = [1, 1]} : vector<8x32xbf16> to vector<8x16xbf16>
    %26 = vector.extract_strided_slice %23 {offsets = [0, 0], sizes = [8, 16], strides = [1, 1]} : vector<8x32xbf16> to vector<8x16xbf16>
    %cst_9 = arith.constant dense<0.000000e+00> : vector<8x8xf32>
    %27 = tpu.matmul %24, %25, %cst_9 {dimension_numbers = #tpu.dot_dimension_numbers<[1], [1], [0], [0], [0, 0, 1, 0], [], []>} : vector<8x16xbf16>, vector<8x16xbf16>, vector<8x8xf32> -> vector<8x8xf32>
    %c0_10 = arith.constant 0 : index
    %c0_11 = arith.constant 0 : index
    %c0_12 = arith.constant 0 : index
    %28 = vector.load %arg2[%c0_10, %c0_11, %c0_12] : memref<2x8x8xf32, #tpu.memory_space<vmem>>, vector<1x8x8xf32>
    %29 = vector.shape_cast %28 : vector<1x8x8xf32> to vector<8x8xf32>
    %30 = arith.addf %27, %29 : vector<8x8xf32>
    %cst_13 = arith.constant dense<0xFF800000> : vector<8xf32>
    %31 = vector.multi_reduction <maximumf>, %30, %cst_13 [1] : vector<8x8xf32> to vector<8xf32>
    %32 = vector.shape_cast %31 : vector<8xf32> to vector<8x1xf32>
    %33 = vector.broadcast %32 : vector<8x1xf32> to vector<8x8xf32>
    %34 = arith.subf %30, %33 : vector<8x8xf32>
    %35 = math.exp %34 : vector<8x8xf32>
    %cst_14 = arith.constant dense<0.000000e+00> : vector<8xf32>
    %36 = vector.multi_reduction <add>, %35, %cst_14 [1] : vector<8x8xf32> to vector<8xf32>
    %37 = vector.shape_cast %36 : vector<8xf32> to vector<8x1xf32>
    %38 = arith.truncf %35 : vector<8x8xf32> to vector<8x8xbf16>
    %cst_15 = arith.constant dense<0.000000e+00> : vector<8x16xf32>
    %39 = tpu.matmul %38, %26, %cst_15 {dimension_numbers = #tpu.dot_dimension_numbers<[1], [0], [0], [1], [0, 0, 1, 1], [], []>} : vector<8x8xbf16>, vector<8x16xbf16>, vector<8x16xf32> -> vector<8x16xf32>
    %40 = tpu.reciprocal %37 : vector<8x1xf32> -> vector<8x1xf32>
    %41 = vector.broadcast %40 : vector<8x1xf32> to vector<8x16xf32>
    %42 = arith.mulf %39, %41 : vector<8x16xf32>
    %43 = vector.extract_strided_slice %19 {offsets = [0, 16], sizes = [8, 16], strides = [1, 1]} : vector<8x32xbf16> to vector<8x16xbf16>
    %44 = vector.extract_strided_slice %21 {offsets = [0, 16], sizes = [8, 16], strides = [1, 1]} : vector<8x32xbf16> to vector<8x16xbf16>
    %45 = vector.extract_strided_slice %23 {offsets = [0, 16], sizes = [8, 16], strides = [1, 1]} : vector<8x32xbf16> to vector<8x16xbf16>
    %cst_16 = arith.constant dense<0.000000e+00> : vector<8x8xf32>
    %46 = tpu.matmul %43, %44, %cst_16 {dimension_numbers = #tpu.dot_dimension_numbers<[1], [1], [0], [0], [0, 0, 1, 0], [], []>} : vector<8x16xbf16>, vector<8x16xbf16>, vector<8x8xf32> -> vector<8x8xf32>
    %c1 = arith.constant 1 : index
    %c0_17 = arith.constant 0 : index
    %c0_18 = arith.constant 0 : index
    %47 = vector.load %arg2[%c1, %c0_17, %c0_18] : memref<2x8x8xf32, #tpu.memory_space<vmem>>, vector<1x8x8xf32>
    %48 = vector.shape_cast %47 : vector<1x8x8xf32> to vector<8x8xf32>
    %49 = arith.addf %46, %48 : vector<8x8xf32>
    %cst_19 = arith.constant dense<0xFF800000> : vector<8xf32>
    %50 = vector.multi_reduction <maximumf>, %49, %cst_19 [1] : vector<8x8xf32> to vector<8xf32>
    %51 = vector.shape_cast %50 : vector<8xf32> to vector<8x1xf32>
    %52 = vector.broadcast %51 : vector<8x1xf32> to vector<8x8xf32>
    %53 = arith.subf %49, %52 : vector<8x8xf32>
    %54 = math.exp %53 : vector<8x8xf32>
    %cst_20 = arith.constant dense<0.000000e+00> : vector<8xf32>
    %55 = vector.multi_reduction <add>, %54, %cst_20 [1] : vector<8x8xf32> to vector<8xf32>
    %56 = vector.shape_cast %55 : vector<8xf32> to vector<8x1xf32>
    %57 = arith.truncf %54 : vector<8x8xf32> to vector<8x8xbf16>
    %cst_21 = arith.constant dense<0.000000e+00> : vector<8x16xf32>
    %58 = tpu.matmul %57, %45, %cst_21 {dimension_numbers = #tpu.dot_dimension_numbers<[1], [0], [0], [1], [0, 0, 1, 1], [], []>} : vector<8x8xbf16>, vector<8x16xbf16>, vector<8x16xf32> -> vector<8x16xf32>
    %59 = tpu.reciprocal %56 : vector<8x1xf32> -> vector<8x1xf32>
    %60 = vector.broadcast %59 : vector<8x1xf32> to vector<8x16xf32>
    %61 = arith.mulf %58, %60 : vector<8x16xf32>
    %62 = tpu.concatenate %42, %61 in 1 : vector<8x16xf32>, vector<8x16xf32> -> vector<8x32xf32>
    %63 = arith.truncf %62 : vector<8x32xf32> to vector<8x32xbf16>
    %c0_22 = arith.constant 0 : index
    %c0_23 = arith.constant 0 : index
    %64 = vector.load %arg5[%c0_22, %c0_23] : memref<32x32xbf16, #tpu.memory_space<vmem>>, vector<32x32xbf16>
    %cst_24 = arith.constant dense<0.000000e+00> : vector<8x32xf32>
    %65 = tpu.matmul %63, %64, %cst_24 {dimension_numbers = #tpu.dot_dimension_numbers<[1], [0], [0], [1], [0, 0, 1, 1], [], []>} : vector<8x32xbf16>, vector<32x32xbf16>, vector<8x32xf32> -> vector<8x32xf32>
    %66 = arith.addf %1, %65 : vector<8x32xf32>
    %c0_25 = arith.constant 0 : index
    %c0_26 = arith.constant 0 : index
    %67 = vector.load %arg6[%c0_25, %c0_26] : memref<1x32xf32, #tpu.memory_space<vmem>>, vector<1x32xf32>
    %68 = arith.mulf %66, %66 : vector<8x32xf32>
    %cst_27 = arith.constant dense<0.000000e+00> : vector<8xf32>
    %69 = vector.multi_reduction <add>, %68, %cst_27 [1] : vector<8x32xf32> to vector<8xf32>
    %70 = vector.shape_cast %69 : vector<8xf32> to vector<8x1xf32>
    %cst_28 = arith.constant 3.200000e+01 : f32
    %71 = vector.broadcast %cst_28 : f32 to vector<8x1xf32>
    %72 = arith.divf %70, %71 : vector<8x1xf32>
    %cst_29 = arith.constant 9.99999997E-7 : f32
    %73 = vector.broadcast %cst_29 : f32 to vector<8x1xf32>
    %74 = arith.addf %72, %73 : vector<8x1xf32>
    %75 = math.rsqrt %74 : vector<8x1xf32>
    %76 = vector.broadcast %75 : vector<8x1xf32> to vector<8x32xf32>
    %77 = arith.mulf %66, %76 : vector<8x32xf32>
    %78 = vector.broadcast %67 : vector<1x32xf32> to vector<8x32xf32>
    %79 = arith.mulf %77, %78 : vector<8x32xf32>
    %80 = arith.truncf %79 : vector<8x32xf32> to vector<8x32xbf16>
    %c0_30 = arith.constant 0 : index
    %c0_31 = arith.constant 0 : index
    %81 = vector.load %arg7[%c0_30, %c0_31] : memref<32x256xbf16, #tpu.memory_space<vmem>>, vector<32x256xbf16>
    %cst_32 = arith.constant dense<0.000000e+00> : vector<8x256xf32>
    %82 = tpu.matmul %80, %81, %cst_32 {dimension_numbers = #tpu.dot_dimension_numbers<[1], [0], [0], [1], [0, 0, 1, 1], [], []>} : vector<8x32xbf16>, vector<32x256xbf16>, vector<8x256xf32> -> vector<8x256xf32>
    %83 = vector.extract_strided_slice %82 {offsets = [0, 0], sizes = [8, 128], strides = [1, 1]} : vector<8x256xf32> to vector<8x128xf32>
    %84 = vector.extract_strided_slice %82 {offsets = [0, 128], sizes = [8, 128], strides = [1, 1]} : vector<8x256xf32> to vector<8x128xf32>
    %85 = arith.negf %83 : vector<8x128xf32>
    %86 = math.exp %85 : vector<8x128xf32>
    %cst_33 = arith.constant 1.000000e+00 : f32
    %87 = vector.broadcast %cst_33 : f32 to vector<8x128xf32>
    %88 = arith.addf %87, %86 : vector<8x128xf32>
    %89 = arith.divf %87, %88 : vector<8x128xf32>
    %90 = arith.mulf %83, %89 : vector<8x128xf32>
    %91 = arith.mulf %90, %84 : vector<8x128xf32>
    %92 = arith.truncf %91 : vector<8x128xf32> to vector<8x128xbf16>
    %c0_34 = arith.constant 0 : index
    %c0_35 = arith.constant 0 : index
    %93 = vector.load %arg8[%c0_34, %c0_35] : memref<128x32xbf16, #tpu.memory_space<vmem>>, vector<128x32xbf16>
    %cst_36 = arith.constant dense<0.000000e+00> : vector<8x32xf32>
    %94 = tpu.matmul %92, %93, %cst_36 {dimension_numbers = #tpu.dot_dimension_numbers<[1], [0], [0], [1], [0, 0, 1, 1], [], []>} : vector<8x128xbf16>, vector<128x32xbf16>, vector<8x32xf32> -> vector<8x32xf32>
    %95 = arith.addf %66, %94 : vector<8x32xf32>
    %c0_37 = arith.constant 0 : index
    %c0_38 = arith.constant 0 : index
    %c0_39 = arith.constant 0 : index
    %96 = vector.load %arg9[%c0_37, %c0_38, %c0_39] : memref<1x8x32xf32, #tpu.memory_space<vmem>>, vector<1x8x32xf32>
    %97 = vector.shape_cast %96 : vector<1x8x32xf32> to vector<8x32xf32>
    %98 = vector.shape_cast %95 : vector<8x32xf32> to vector<1x8x32xf32>
    tpu.vector_store %arg9[%c0_37, %c0_38, %c0_39], %98 {strides = array<i32>} : memref<1x8x32xf32, #tpu.memory_space<vmem>>, vector<1x8x32xf32>,
    return
  }
  func.func @transform_0(%arg0: i32) -> (i32, i32, i32) {
    %c0_i32 = arith.constant 0 : i32
    %c0_i32_0 = arith.constant 0 : i32
    %c0_i32_1 = arith.constant 0 : i32
    return %arg0, %c0_i32, %c0_i32_0 : i32, i32, i32
  }
  func.func @transform_1(%arg0: i32) -> (i32, i32, i32) {
    %c0_i32 = arith.constant 0 : i32
    %c0_i32_0 = arith.constant 0 : i32
    %c0_i32_1 = arith.constant 0 : i32
    %c0_i32_2 = arith.constant 0 : i32
    return %c0_i32, %c0_i32_0, %c0_i32_1 : i32, i32, i32
  }
  func.func @transform_2(%arg0: i32) -> (i32, i32) {
    %c0_i32 = arith.constant 0 : i32
    %c0_i32_0 = arith.constant 0 : i32
    %c0_i32_1 = arith.constant 0 : i32
    return %c0_i32, %c0_i32_0 : i32, i32
  }
  func.func @transform_3(%arg0: i32) -> (i32, i32) {
    %c0_i32 = arith.constant 0 : i32
    %c0_i32_0 = arith.constant 0 : i32
    %c0_i32_1 = arith.constant 0 : i32
    return %c0_i32, %c0_i32_0 : i32, i32
  }
  func.func @transform_4(%arg0: i32) -> (i32, i32) {
    %c0_i32 = arith.constant 0 : i32
    %c0_i32_0 = arith.constant 0 : i32
    %c0_i32_1 = arith.constant 0 : i32
    return %c0_i32, %c0_i32_0 : i32, i32
  }
  func.func @transform_5(%arg0: i32) -> (i32, i32) {
    %c0_i32 = arith.constant 0 : i32
    %c0_i32_0 = arith.constant 0 : i32
    %c0_i32_1 = arith.constant 0 : i32
    return %c0_i32, %c0_i32_0 : i32, i32
  }
  func.func @transform_6(%arg0: i32) -> (i32, i32) {
    %c0_i32 = arith.constant 0 : i32
    %c0_i32_0 = arith.constant 0 : i32
    %c0_i32_1 = arith.constant 0 : i32
    return %c0_i32, %c0_i32_0 : i32, i32
  }
  func.func @transform_7(%arg0: i32) -> (i32, i32) {
    %c0_i32 = arith.constant 0 : i32
    %c0_i32_0 = arith.constant 0 : i32
    %c0_i32_1 = arith.constant 0 : i32
    return %c0_i32, %c0_i32_0 : i32, i32
  }
  func.func @transform_8(%arg0: i32) -> (i32, i32, i32) {
    %c0_i32 = arith.constant 0 : i32
    %c0_i32_0 = arith.constant 0 : i32
    %c0_i32_1 = arith.constant 0 : i32
    return %arg0, %c0_i32, %c0_i32_0 : i32, i32, i32
  }
}

</mosaic_0001>

<bundles_post_ra>
// kernel: tpu_custom_call.1
= control target key start
LH: loop header
LB: loop body
LE: loop exit
PB: predicated region body
PF: predicated region fallthrough
CT: control target
= control target key end

     0   :  { %13 = vsyncpa [#allocation3], 0  ;;  %s1363_s0 = inlined_call_operand.vmem [shape: f32[2,8,32], index: 0, kind: input, shape index: {}]   ;;  %s1364_s1 = inlined_call_operand.vmem [shape: f32[2,8,8], index: 1, kind: input, shape index: {}]   ;;  %s1365_s2 = inlined_call_operand.vmem [shape: f32[1,32], index: 2, kind: input, shape index: {}]   ;;  %s1366_s3 = inlined_call_operand.vmem [shape: bf16[32,96], index: 3, kind: input, shape index: {}]   ;;  %s1367_s4 = inlined_call_operand.hbm [shape: bf16[32,32], index: 4, kind: input, shape index: {}]   ;;  %s1368_s5 = inlined_call_operand.vmem [shape: f32[1,32], index: 5, kind: input, shape index: {}]   ;;  %s1369_s6 = inlined_call_operand.vmem [shape: bf16[32,256], index: 6, kind: input, shape index: {}]   ;;  %s1370_s7 = inlined_call_operand.vmem [shape: bf16[128,32], index: 7, kind: input, shape index: {}]   ;;  %s1371_s8 = inlined_call_operand.hbm [shape: f32[2,8,32], index: 8, kind: output, shape index: {}]  }
   0x1   :  { %14 = vsyncpa [#allocation4], 0 }
   0x2   :  { %16 = vsyncpa [#allocation4 + $0x1], 0  ;;  %s1166_s27 = smov 0   ;;  %s1168_s28 = smov 0  }
   0x3   :  { %s1170_s29 = smov 0   ;;  %s1172_s30 = smov 0  }
   0x4 LB: > { %s1187_s9 = sadd.s32 4294967295, %s1109_s30   ;;  %s832_s10 = sadd.s32 4294967294, %s1109_s30   ;;  %s1109_s30 = sphi %s1172_s30, %s1377_s30   ;;  %s1105_s29 = sphi %s1170_s29, %s1376_s29   ;;  %s1101_s28 = sphi %s1168_s28, %s1375_s28   ;;  %s1097_s27 = sphi %s1166_s27, %s1374_s27  }
   0x5   : > { %s1191_s11 = sadd.s32 1, %s1109_s30   ;;  %s202_s12 = sadd.s32 1, %s1105_s29 }
   0x6   : > { %s199_s13 = ssub.s32 %s1109_s30, %s1191_s11  ;;  %p212_p0 = scmp.ne.s32.totalorder %s1105_s29, %s1101_s28 }
   0x7   : > { %p200_p1 = scmp.eq.s32.totalorder %s199_s13, 0  ;;  %p213_p2 = scmp.eq.s32.totalorder %s1187_s9, 1 }
   0x8   : > { %p218_p3 = scmp.ne.s32.totalorder %s1101_s28, %s1097_s27  ;;  %p219_p4 = scmp.eq.s32.totalorder %s832_s10, 1 }
   0x9   : > { %s1202_s14 = scalar_select %p200_p1, %s1105_s29, %s202_s12  }
   0xa   : > { %p1204_p5 = por %p213_p2, %p212_p0  ;;  %p1208_p6 = por %p219_p4, %p218_p3 }
   0xb   : > { %p833_p7 = scmp.ge.s32.totalorder %s1109_s30, 1  ;;  %p226_p8 = scmp.lt.s32.totalorder %s1109_s30, 3 }
   0xc   : > { %p948_p9 = scmp.eq.s32.totalorder %s1187_s9, 0  ;;  %s246_s19 = sshll.u32 %s1367_s4, 4  ;;  %s247_s19 = int_to_ptr.hbm [resolvable:$true] %s246_s19 }
   0xd   : > { %p227_p10 = pnand %p833_p7, %p226_p8  ;;  %s1111_s20 = smov [#allocation2]  }
   0xe   : > { %s248_s21 = sshll.u32 %s1111_s20, 4  ;;  %s1112_s22 = smov 64   ;;  %s249_s21 = int_to_ptr.vmem [resolvable:$true] %s248_s21 }
   0xf   : > { %p940_p11 = pneg %p227_p10  ;;  %s1113_s23 = smov 4  }
  0x10   : > { %280 = sbr.rel (%p227_p10) target bundleno = 1522 (0x5f2), region = 52 }
  0x11   : > { %p941_p12 = pnand %p948_p9, %p940_p11 }
  0x13   : > { %943 = dma.hbm_to_vmem [thread:$0]  (!%p941_p12), %s247_s19, 256, %s249_s21, [#allocation3], %s1112_s22, %s1112_s22, %s1113_s23  }
  0x15   : > { %1088 = dma.done.wait (%p948_p9), [#allocation3], 256  }
  0x16   : > { %1090 = vsyncadd (%p948_p9), [#allocation3], 4294967040  ;;  %p314_p13 = scmp.lt.s32.totalorder %s1187_s9, 1  ;;  %vm322_vm0 = vcmask 261120   ;;  %v1114_v3 = vmov 32.0   ;;  %v919_v7 = vld [vmem:[%s1366_s3 + $0x8] sm:$0xff] }
  0x17   : > { %995 = vrcp.f32 %v1114_v3  ;;  %376 = vmatpush.bf16.msra.mxu0 %v919_v7  ;;  %v918_v9 = vld [vmem:[%s1366_s3] sm:$0xff]  ;;  %s1115_s22 = smov 112   ;;  %s1116_s23 = smov 80   ;;  %vm390_vm5 = vcmask 130048   ;;  %vm426_vm6 = vcmask 1043456   ;;  %v851_v38 = vld [vmem:[%s1364_s1 + $0x8] sm:$0xff] }
  0x18   : > { %s315_s24 = scalar_select %p314_p13, %s1187_s9, 1  ;;  %v993_v21 = vld [vmem:[%s1365_s2] ss:$0 sm:$0xff]  ;;  %vm410_vm7 = vcmask 64512   ;;  %v921_v62 = vld [vmem:[#allocation2 + $0x8] sm:$0xff] }
  0x19   : > { %v384_v40 = vld [vmem:[%s1364_s1] sm:$0xff]  ;;  %s1119_s17 = smov 48   ;;  %s1120_s18 = smov 16  }
  0x1a   : > { %s839_s25 = sshll.u32 %s315_s24, 3  ;;  %s1117_s24 = smov 96   ;;  %v920_v63 = vld [vmem:[#allocation2] sm:$0xff] }
  0x1b   : > { %s317_s12 = scalar_lea.vmem %s1363_s0, %s839_s25  ;;  %377 = vmatpush.bf16.msra.mxu0 %v918_v9  ;;  %s1118_s25 = smov 64  }
  0x1c   : > { %v1229_v0 = vld [vmem:[%s317_s12] sm:$0xff]  ;;  %s311_s10 = sand.u32 1, %s1101_s28   ;;  %s915_s12 = sshll.u32 %s1187_s9, 3 }
  0x1d   : > { %v321_v1 = vmul.f32 %v1229_v0, %v1229_v0  ;;  %v996_v4 = vpop.eup %995  ;;  %s838_s13 = sshll.u32 %s311_s10, 3  ;;  %s756_s19 = scalar_lea.hbm %s1371_s8, %s915_s12 }
  0x1e   : > { %v327_v5 = vmul.f32 32.0, %v996_v4  ;;  %vm331_vm1 = vweird.f32 %v996_v4  ;;  %s313_s20 = scalar_lea.vmem [#allocation5], %s838_s13  ;;  %s1063_s12 = scalar_lea.hbm %s1371_s8, 16 }
  0x1f   : > { %v323_v2 = vsel %vm322_vm0, %v321_v1, 0.0  ;;  %s758_s21 = sshll.u32 %s313_s20, 4  ;;  %s759_s21 = int_to_ptr.vmem [resolvable:$true] %s758_s21 }
  0x20   : > { %324 = vadd.xlane.f32.xlu0 %v323_v2  ;;  %v328_v6 = vsub.f32 1.0, %v327_v5 }
  0x22   : > { %v329_v8 = vmul.f32 %v996_v4, %v328_v6 }
  0x24   : > { %v330_v10 = vadd.f32 %v996_v4, %v329_v8 }
  0x26   : > { %v1240_v11 = vsel %vm331_vm1, %v996_v4, %v330_v10 }
  0x93   : > { %v325_v12 = vpop.xlane.xlu0 %324 }
  0x94   : > { %v333_v13 = vmul.f32 %v1240_v11, %v325_v12 }
  0x96   : > { %v334_v14 = vadd.f32 1e-06, %v333_v13 }
  0x98   : > { %997 = vrsqrt.f32 %v334_v14  ;;  %vm341_vm3 = vweird.f32 %v334_v14 }
  0x9e   : > { %v998_v15 = vpop.eup %997 }
  0x9f   : > { %v336_v16 = vmul.f32 %v998_v15, %v334_v14  ;;  %vm342_vm2 = vweird.f32 %v998_v15 }
  0xa0   : > { %vm343_vm4 = vmor %vm341_vm3, %vm342_vm2 }
  0xa1   : > { %v337_v17 = vmul.f32 %v998_v15, %v336_v16 }
  0xa3   : > { %v338_v18 = vmul.f32 0.5, %v337_v17 }
  0xa5   : > { %v339_v19 = vsub.f32 1.5, %v338_v18 }
  0xa7   : > { %v340_v20 = vmul.f32 %v998_v15, %v339_v19 }
  0xa9   : > { %v344_v22 = vsel %vm343_vm4, %v998_v15, %v340_v20 }
  0xaa   : > { %v345_v23 = vmul.f32 %v344_v22, %v1229_v0 }
  0xac   : > { %v349_v24 = vmul.f32 %v993_v21, %v345_v23 }
  0xae   : > { %v350_v25 = vpack.c.bf16 %v349_v24, %v349_v24 }
  0xb0   : > { %848 = vmatmul.msk.bf16.vlgmr.msra.gmra.mxu0 %vm322_vm0, %v350_v25 }
 0x12d   : > { %v379_v26 = vpop.f32.mrf.mxu0 }
 0x12e   : > { %v383_v27 = vpack.c.bf16 %v379_v26, %v379_v26 }
 0x130   : > { %v386_v28 = vunpack.c.l.b16 %v383_v27 }
 0x132   : > { %v387_v29 = vpack.c.b16 %v386_v28, %v386_v28 }
 0x134   : > { %460 = vrot.lane.b32.xlu1 %v387_v29, %s1115_s22  ;;  %462 = vrot.lane.b32.xlu0 %v387_v29, %s1116_s23  ;;  %s760_s22 = sshll.u32 %s756_s19, 4  ;;  %s746_s23 = scalar_lea.sflag [#allocation4], %s311_s10  ;;  %s761_s22 = int_to_ptr.hbm [resolvable:$true] %s760_s22 }
 0x135   : > { %v381_v30 = vpop.f32.mrf.mxu0 }
 0x13c   : > { %388 = vrot.lane.b32.xlu1 %v387_v29, %s1117_s24  ;;  %421 = vrot.lane.b32.xlu0 %v387_v29, %s1118_s25  ;;  %s1057_s24 = sshra.s32 %s761_s22, 4  ;;  %s1058_s24 = int_to_ptr.hbm [resolvable:$true] %s1057_s24 }
 0x13d   : > { %s1059_s9 = scalar_lea.hbm %s1058_s24, 8  ;;  %p1064_p3 = scmp.lt.s32.totalorder %s1058_s24, %s1371_s8 }
 0x13e   : > { %p1060_p0 = scmp.ne.s32.totalorder %s1058_s24, %s1059_s9  ;;  %p1065_p4 = scmp.lt.s32.totalorder %s1063_s12, %s1059_s9 }
 0x140   : > { %p1061_p1 = pnand %p1060_p0, %p1204_p5  ;;  %p1066_p7 = por %p1065_p4, %p1064_p3 }
 0x142   : > { %p1062_p2 = pneg %p1061_p1 }
 0x144   : > { %p1067_p8 = pnand %p1066_p7, %p1062_p2 }
 0x1a6   : > { %v461_v31 = vpop.permute.xlu1 %460  ;;  %v463_v32 = vpop.permute.xlu0 %462 }
 0x1a7   : > { %v468_v33 = vsel %vm390_vm5, %v463_v32, 0 }
 0x1a8   : > { %477 = vmatpush.bf16.xpose.msra.mxu3 %v468_v33 }
 0x1ae   : > { %v389_v34 = vpop.permute.xlu1 %388  ;;  %v422_v35 = vpop.permute.xlu0 %421 }
 0x1af   : > { %852 = vmatmul.msk.bf16.vlgmr.msra.gmra.mxu3 %vm390_vm5, %v461_v31  ;;  %v395_v36 = vsel %vm390_vm5, %v389_v34, 0  ;;  %v428_v37 = vsel %vm426_vm6, %v422_v35, 0 }
 0x1b0   : > { %404 = vmatpush.bf16.xpose.msra.mxu1 %v395_v36  ;;  %437 = vmatpush.bf16.msrb.mxu0 %v428_v37 }
 0x1b4   : > { %560 = vmatpush.bf16.msra.mxu0 %v921_v62  ;;  %v933_v62 = vld [vmem:[%s1370_s7 + $0x38] sm:$0xff] }
 0x1b7   : > { %849 = vmatmul.msk.bf16.vlgmr.msra.gmra.mxu1 %vm390_vm5, %v383_v27 }
 0x1b8   : > { %561 = vmatpush.bf16.msra.mxu0 %v920_v63  ;;  %v932_v63 = vld [vmem:[%s1370_s7 + $0x30] sm:$0xff] }
 0x232   : > { %v479_v39 = vpop.f32.mrf.mxu3 }
 0x233   : > { %v480_v41 = vadd.f32 %v851_v38, %v479_v39  ;;  %v873_v38 = vld [vmem:[%s1369_s6 + $0x10] sm:$0xf]  ;;  %v925_v39 = vld [vmem:[%s1369_s6 + $0x14] sm:$0xf0] }
 0x234   : > { %v406_v42 = vpop.f32.mrf.mxu1 }
 0x235   : > { %v407_v43 = vadd.f32 %v406_v42, %v384_v40  ;;  %v483_v44 = vsel %vm410_vm7, %v480_v41, -inf  ;;  %v874_v40 = vor.u32 %v925_v39, %v873_v38 }
 0x236   : > { %484 = vmax.xlane.f32.xlu2 %v483_v44  ;;  %v923_v44 = vld [vmem:[%s1369_s6 + $0x4] sm:$0xf0] }
 0x237   : > { %v411_v45 = vsel %vm410_vm7, %v407_v43, -inf  ;;  %624 = vmatpush.bf16.msrb.mxu1 %v874_v40 }
 0x238   : > { %412 = vmax.xlane.f32.xlu1 %v411_v45  ;;  %v922_v45 = vld [vmem:[%s1369_s6 + $0x4] sm:$0xf] }
 0x23a   : > { %v481_v46 = vpop.f32.mrf.mxu3 }
 0x23c   : > { %v408_v47 = vpop.f32.mrf.mxu1 }
 0x23d   : > { %v867_v47 = vld [vmem:[%s1369_s6 + $0x8] sm:$0xf0] }
 0x24e   : > { %493 = vrot.lane.b32.xlu2 %v387_v29, %s1119_s17 }
 0x2a9   : > { %v485_v48 = vpop.xlane.xlu2 %484 }
 0x2aa   : > { %v486_v49 = vsub.f32 %v480_v41, %v485_v48  ;;  %v875_v41 = vld [vmem:[%s1369_s6 + $0x18] sm:$0xf0]  ;;  %v870_v48 = vor.u32 %v922_v45, %v867_v47 }
 0x2ab   : > { %v413_v50 = vpop.xlane.xlu1 %412 }
 0x2ac   : > { %v487_v51 = vmul.f32 1.442695, %v486_v49  ;;  %v414_v52 = vsub.f32 %v407_v43, %v413_v50  ;;  %v865_v43 = vld [vmem:[%s1369_s6] sm:$0xf] }
 0x2ad   : > { %v866_v46 = vor.u32 %v923_v44, %v865_v43 }
 0x2ae   : > { %999 = vpow2.f32 %v487_v51  ;;  %v415_v53 = vmul.f32 1.442695, %v414_v52 }
 0x2af   : > { %625 = vmatpush.bf16.msrb.mxu1 %v866_v46 }
 0x2b0   : > { %1001 = vpow2.f32 %v415_v53 }
 0x2b1   : > { %v494_v54 = vpop.permute.xlu2 %493 }
 0x2b2   : > { %v499_v55 = vsel %vm426_vm6, %v494_v54, 0 }
 0x2b3   : > { %508 = vmatpush.bf16.msra.mxu2 %v499_v55 }
 0x2b4   : > { %v1000_v56 = vpop.eup %999 }
 0x2b5   : > { %v489_v57 = vsel %vm410_vm7, %v1000_v56, 0.0  ;;  %v492_v58 = vpack.c.bf16 %v1000_v56, %v1000_v56 }
 0x2b6   : > { %v1002_v59 = vpop.eup %1001  ;;  %490 = vadd.xlane.f32.xlu2 %v489_v57 }
 0x2b7   : > { %853 = vmatmul.msk.bf16.vlgmr.msra.gmra.mxu2 %vm410_vm7, %v492_v58  ;;  %v417_v60 = vsel %vm410_vm7, %v1002_v59, 0.0  ;;  %v420_v61 = vpack.c.bf16 %v1002_v59, %v1002_v59  ;;  %v994_v58 = vld [vmem:[%s1368_s5] ss:$0 sm:$0xff] }
 0x2b8   : > { %418 = vadd.xlane.f32.xlu0 %v417_v60  ;;  %730 = vmatpush.bf16.msrb.mxu2 %v933_v62 }
 0x2b9   : > { %850 = vmatmul.msk.bf16.vlgmr.msrb.gmra.mxu0 %vm410_vm7, %v420_v61 }
 0x2bc   : > { %731 = vmatpush.bf16.msrb.mxu2 %v932_v63 }
 0x329   : > { %v491_v1 = vpop.xlane.xlu2 %490 }
 0x32a   : > { %1003 = vrcp.f32 %v491_v1  ;;  %v525_v5 = vand.u32 2147483648, %v491_v1  ;;  %v523_v7 = vand.u32 2147483647, %v491_v1  ;;  %vm519_vm9 = vweird.f32 %v491_v1 }
 0x32b   : > { %v419_v18 = vpop.xlane.xlu0 %418 }
 0x32c   : > { %v526_v10 = vor.u32 1.1754944e-38, %v525_v5  ;;  %vm524_vm11 = vcmp.eq.f32.partialorder %v523_v7, 8.507059e+37  ;;  %1005 = vrcp.f32 %v419_v18  ;;  %v454_v24 = vand.u32 2147483648, %v419_v18  ;;  %v927_v5 = vld [vmem:[%s1370_s7 + $0x8] sm:$0xff] }
 0x32d   : > { %vm448_vm13 = vweird.f32 %v419_v18  ;;  %v452_v25 = vand.u32 2147483647, %v419_v18 }
 0x32e   : > { %v455_v27 = vor.u32 1.1754944e-38, %v454_v24 }
 0x32f   : > { %vm453_vm15 = vcmp.eq.f32.partialorder %v452_v25, 8.507059e+37 }
 0x330   : > { %v1004_v2 = vpop.eup %1003 }
 0x331   : > { %v515_v3 = vmul.f32 %v1004_v2, %v491_v1  ;;  %vm520_vm8 = vweird.f32 %v1004_v2  ;;  %v931_v1 = vld [vmem:[%s1370_s7 + $0x28] sm:$0xff] }
 0x332   : > { %vm521_vm10 = vmor %vm519_vm9, %vm520_vm8  ;;  %v1006_v19 = vpop.eup %1005  ;;  %732 = vmatpush.bf16.msrb.mxu2 %v931_v1 }
 0x333   : > { %v516_v4 = vsub.f32 1.0, %v515_v3  ;;  %v444_v20 = vmul.f32 %v1006_v19, %v419_v18  ;;  %vm449_vm12 = vweird.f32 %v1006_v19  ;;  %v929_v3 = vld [vmem:[%s1370_s7 + $0x18] sm:$0xff] }
 0x334   : > { %vm450_vm14 = vmor %vm448_vm13, %vm449_vm12 }
 0x335   : > { %v517_v6 = vmul.f32 %v1004_v2, %v516_v4  ;;  %v445_v21 = vsub.f32 1.0, %v444_v20  ;;  %v928_v4 = vld [vmem:[%s1370_s7 + $0x10] sm:$0xff] }
 0x336   : > { %v439_v8 = vpop.f32.mrf.mxu0 }
 0x337   : > { %v518_v9 = vadd.f32 %v1004_v2, %v517_v6  ;;  %v446_v22 = vmul.f32 %v1006_v19, %v445_v21  ;;  %v926_v6 = vld [vmem:[%s1370_s7] sm:$0xff] }
 0x339   : > { %v522_v12 = vsel %vm521_vm10, %v1004_v2, %v518_v9  ;;  %v447_v23 = vadd.f32 %v1006_v19, %v446_v22  ;;  %v930_v2 = vld [vmem:[%s1370_s7 + $0x20] sm:$0xff] }
 0x33a   : > { %v510_v13 = vpop.f32.mrf.mxu2  ;;  %v527_v14 = vsel %vm524_vm11, %v526_v10, %v522_v12  ;;  %733 = vmatpush.bf16.msrb.mxu2 %v930_v2 }
 0x33b   : > { %v528_v15 = vmul.f32 %v527_v14, %v510_v13  ;;  %v451_v26 = vsel %vm450_vm14, %v1006_v19, %v447_v23 }
 0x33c   : > { %v456_v28 = vsel %vm453_vm15, %v455_v27, %v451_v26 }
 0x33d   : > { %530 = vrot.lane.b32.xlu1 %v528_v15, %s1120_s18  ;;  %v457_v29 = vmul.f32 %v456_v28, %v439_v8 }
 0x33e   : > { %v441_v16 = vpop.f32.mrf.mxu0  ;;  %734 = vmatpush.bf16.msrb.mxu2 %v929_v3 }
 0x342   : > { %v512_v17 = vpop.f32.mrf.mxu2  ;;  %735 = vmatpush.bf16.msrb.mxu2 %v928_v4 }
 0x346   : > { %736 = vmatpush.bf16.msrb.mxu2 %v927_v5 }
 0x34a   : > { %737 = vmatpush.bf16.msrb.mxu2 %v926_v6 }
 0x3af   : > { %v531_v30 = vpop.permute.xlu1 %530 }
 0x3b0   : > { %v533_v31 = vsel %vm390_vm5, %v457_v29, %v531_v30 }
 0x3b1   : > { %v534_v32 = vpack.c.bf16 %v533_v31, %v533_v31 }
 0x3b3   : > { %862 = vmatmul.msk.bf16.vlgmr.msra.gmra.mxu0 %vm322_vm0, %v534_v32 }
 0x430   : > { %v563_v33 = vpop.f32.mrf.mxu0 }
 0x431   : > { %v1269_v34 = vadd.f32 %v563_v33, %v1229_v0  ;;  %v924_v0 = vld [vmem:[%s1369_s6 + $0x14] sm:$0xf] }
 0x432   : > { %v878_v42 = vor.u32 %v924_v0, %v875_v41 }
 0x433   : > { %v569_v35 = vmul.f32 %v1269_v34, %v1269_v34 }
 0x434   : > { %637 = vmatpush.bf16.msrb.mxu3 %v878_v42 }
 0x435   : > { %v570_v36 = vsel %vm322_vm0, %v569_v35, 0.0 }
 0x436   : > { %571 = vadd.xlane.f32.xlu2 %v570_v36 }
 0x438   : > { %v565_v37 = vpop.f32.mrf.mxu0  ;;  %638 = vmatpush.bf16.msrb.mxu3 %v870_v48 }
 0x4a9   : > { %v572_v49 = vpop.xlane.xlu2 %571 }
 0x4aa   : > { %v573_v50 = vmul.f32 %v572_v49, %v1240_v11 }
 0x4ac   : > { %v574_v51 = vadd.f32 1e-06, %v573_v50 }
 0x4ae   : > { %1007 = vrsqrt.f32 %v574_v51  ;;  %vm581_vm2 = vweird.f32 %v574_v51 }
 0x4b4   : > { %v1008_v52 = vpop.eup %1007 }
 0x4b5   : > { %v576_v53 = vmul.f32 %v1008_v52, %v574_v51  ;;  %vm582_vm1 = vweird.f32 %v1008_v52 }
 0x4b6   : > { %vm583_vm3 = vmor %vm581_vm2, %vm582_vm1 }
 0x4b7   : > { %v577_v54 = vmul.f32 %v1008_v52, %v576_v53 }
 0x4b9   : > { %v578_v55 = vmul.f32 0.5, %v577_v54 }
 0x4bb   : > { %v579_v56 = vsub.f32 1.5, %v578_v55 }
 0x4bd   : > { %v580_v57 = vmul.f32 %v1008_v52, %v579_v56 }
 0x4bf   : > { %v584_v59 = vsel %vm583_vm3, %v1008_v52, %v580_v57 }
 0x4c0   : > { %v585_v60 = vmul.f32 %v584_v59, %v1269_v34 }
 0x4c2   : > { %v589_v61 = vmul.f32 %v994_v58, %v585_v60 }
 0x4c4   : > { %v590_v11 = vpack.c.bf16 %v589_v61, %v589_v61 }
 0x4c6   : > { %879 = vmatmul.msk.bf16.vlgmr.msrb.gmra.mxu1 %vm322_vm0, %v590_v11  ;;  %880 = vmatmul.msk.bf16.vlgmr.msrb.gmra.mxu3 %vm322_vm0, %v590_v11 }
 0x543   : > { %v627_v7 = vpop.f32.mrf.mxu1 }
 0x544   : > { %v881_v8 = vmul.f32 -1.442695, %v627_v7 }
 0x546   : > { %1009 = vpow2.f32 %v881_v8 }
 0x549   : > { %v640_v9 = vpop.f32.mrf.mxu3 }
 0x54b   : > { %v629_v10 = vpop.f32.mrf.mxu1 }
 0x54c   : > { %v1010_v12 = vpop.eup %1009 }
 0x54d   : > { %v647_v13 = vadd.f32 1.0, %v1010_v12 }
 0x54f   : > { %1011 = vrcp.f32 %v647_v13  ;;  %v659_v18 = vand.u32 2147483648, %v647_v13  ;;  %v657_v20 = vand.u32 2147483647, %v647_v13  ;;  %vm653_vm5 = vweird.f32 %v647_v13 }
 0x551   : > { %v642_v14 = vpop.f32.mrf.mxu3  ;;  %v660_v22 = vor.u32 1.1754944e-38, %v659_v18  ;;  %vm658_vm7 = vcmp.eq.f32.partialorder %v657_v20, 8.507059e+37 }
 0x555   : > { %v1012_v15 = vpop.eup %1011 }
 0x556   : > { %v649_v16 = vmul.f32 %v1012_v15, %v647_v13  ;;  %vm654_vm4 = vweird.f32 %v1012_v15 }
 0x557   : > { %vm655_vm6 = vmor %vm653_vm5, %vm654_vm4 }
 0x558   : > { %v650_v17 = vsub.f32 1.0, %v649_v16 }
 0x55a   : > { %v651_v19 = vmul.f32 %v1012_v15, %v650_v17 }
 0x55c   : > { %v652_v21 = vadd.f32 %v1012_v15, %v651_v19 }
 0x55e   : > { %v656_v23 = vsel %vm655_vm6, %v1012_v15, %v652_v21 }
 0x55f   : > { %v661_v24 = vsel %vm658_vm7, %v660_v22, %v656_v23 }
 0x560   : > { %v663_v25 = vmul.f32 %v661_v24, %v627_v7 }
 0x562   : > { %v664_v26 = vmul.f32 %v663_v25, %v640_v9 }
 0x564   : > { %v665_v27 = vpack.c.bf16 %v664_v26, %v664_v26 }
 0x566   : > { %738 = vmatmul.bf16.vlgmr.msrb.gmra.mxu2 %v665_v27 }
 0x5e9   : > { %v739_v28 = vpop.f32.mrf.mxu2 }
 0x5ea   : > { %v743_v29 = vadd.f32 %v739_v28, %v1269_v34 }
 0x5ec   : > { %744 = vst.msk [vmem:[%s313_s20] sm:$0xff] %vm322_vm0, %v743_v29 }
 0x5ed   : > { %1070 = shalt.err (!%p1067_p8)
}
 0x5ee   : > { %938 = dma.vmem_to_hbm [thread:$0]  (%p1204_p5), %s759_s21, 128, %s761_s22, %s746_s23  }
 0x5f1   : > { %v741_v30 = vpop.f32.mrf.mxu2 }
 0x5f2 PF: > { %p950_p9 = scmp.ge.s32.totalorder %s1109_s30, 2  ;;  %s772_s10 = sand.u32 1, %s1097_s27  }
 0x5f3   : > { %s773_s18 = scalar_lea.sflag [#allocation4], %s772_s10 }
 0x5f4   : > { %p945_p10 = pnand %p950_p9, %p1208_p6 }
 0x5f6   : > { %p946_p11 = pneg %p945_p10 }
 0x5f8   : > { %1092 = dma.done.wait (%p946_p11), %s773_s18, 128  }
 0x5f9   : > { %1094 = vsyncadd (%p946_p11), %s773_s18, 4294967168  ;;  %p19_p12 = scmp.ge.s32.totalorder %s1191_s11, 4   ;;  %s1374_s27 = smov %s1101_s28 }
 0x5fa   : > { %s1375_s28 = smov %s1105_s29  ;;  %s1376_s29 = smov %s1202_s14 }
 0x5fb   : > { %s1377_s30 = smov %s1191_s11  ;;  %21 = sbr.rel (!%p19_p12) target bundleno = 4 (0x4), region = 93 }
 0x600   :  { %779 = vsyncpa [#allocation3], 1 }
 0x601   :  { %781 = vsyncpa [#allocation3 + $0x1], 1 }
 0x602   :  { %782 = vsyncpa [#allocation4], 1 }
 0x603   :  { %784 = vsyncpa [#allocation4 + $0x1], 1 }

</bundles_post_ra>
